<compile_context>
chip_gen: v7x
topology: tpu7x:2x2x1
jax: 0.10.0
libtpu: 0.0.40
codegen_flags: <defaults>
</compile_context>

<pallas_src>
import jax
import jax.numpy as jnp
from jax.experimental import pallas as pl
from jax.experimental.pallas import tpu as pltpu
import numpy as np


# ----------------------------------------------------------------------------
# Mask construction (MaskMaker.make_mask_matrix, mode='pvrnn_inference')
# ----------------------------------------------------------------------------
def make_pvrnn_inference_mask(h_dim, z_dim):
    """Block-diagonal mask of shape (sum(z_dim), sum(h_dim))."""
    Z, H = sum(z_dim), sum(h_dim)
    mask = np.zeros((Z, H), dtype=np.float32)
    z_off, h_off = 0, 0
    for zl, hl in zip(z_dim, h_dim):
        mask[z_off:z_off + zl, h_off:h_off + hl] = 1.0
        z_off += zl
        h_off += hl
    return jnp.asarray(mask)


# ----------------------------------------------------------------------------
# Parameter prep: apply mask, transpose, fuse mean/std layers (done ONCE)
# ----------------------------------------------------------------------------
def prepare_inference_params(params, mask):
    """(w_mean, b_mean, w_std, b_std) torch-layout (Z,H)/(Z,) ->
       fused w (H, 2Z), fused b (1, 2Z), with the mask already baked in."""
    w_mean, b_mean, w_std, b_std = params
    Z, H = mask.shape
    w_fused = jnp.concatenate([(w_mean * mask).T, (w_std * mask).T], axis=1)  # (H, 2Z)
    b_fused = jnp.concatenate([b_mean, b_std]).reshape(1, 2 * Z)              # (1, 2Z)
    return w_fused.astype(jnp.float32), b_fused.astype(jnp.float32)


# ----------------------------------------------------------------------------
# Pallas kernel: fused matmul + bias + adaptive add, then tanh/exp heads
# written as ONE lane-contiguous (TM, 2Z) store.
# ----------------------------------------------------------------------------
def _inference_kernel(h_ref, w_ref, b_ref, a_ref, out_ref):
    Z2 = out_ref.shape[-1]
    Z = Z2 // 2
    # (TM, H) @ (H, 2Z) -> (TM, 2Z), contracting the last axis of both
    # operands feeds the MXU directly (no transpose on the critical path).
    pre = (jnp.dot(h_ref[...], w_ref[...], preferred_element_type=jnp.float32)
           + b_ref[...] + a_ref[...])
    lane = jax.lax.broadcasted_iota(jnp.int32, pre.shape, dimension=1)
    # tanh head on lanes [0, Z), exp head on lanes [Z, 2Z) — single store.
    out_ref[...] = jnp.where(lane < Z, jnp.tanh(pre), jnp.exp(pre))


def _round_up(x, m):
    return (x + m - 1) // m * m


def inference_model_forward(hidden, fused_params, adaptive_vars=None):
    """Mirrors InferenceModel.forward.

    hidden:        (..., sum(h_dim)) float32 — leading dims may be batch
                   and/or time (all rows are processed in one pallas_call).
    fused_params:  (w_fused (H, 2Z), b_fused (1, 2Z)) from prepare_inference_params
    adaptive_vars: (..., 2*sum(z_dim)) float32 or None
    returns:       [mu_inference, sigma_inference], each (..., sum(z_dim))
    """
    w_fused, b_fused = fused_params
    H, Z2 = w_fused.shape
    Z = Z2 // 2

    lead_shape = hidden.shape[:-1]
    assert hidden.shape[-1] == H

    if adaptive_vars is None:
        # Matches torch: returns NaN-filled tensors, no kernel launch.
        nan = jnp.full(lead_shape + (Z,), jnp.nan, dtype=hidden.dtype)
        return [nan, nan]

    M = int(np.prod(lead_shape)) if lead_shape else 1
    h2 = hidden.reshape(M, H).astype(jnp.float32)
    a2 = adaptive_vars.reshape(M, Z2).astype(jnp.float32)

    # Row tile: at least the f32 sublane tile (8); 128 for large batches so
    # the MXU M dimension fills. Weights / bias stay VMEM-resident across the
    # grid (constant index_map); only hidden/adaptive tiles are streamed.
    TM = 128 if M >= 128 else _round_up(M, 8)
    M_pad = _round_up(M, TM)
    if M_pad != M:
        h2 = jnp.pad(h2, ((0, M_pad - M), (0, 0)))
        a2 = jnp.pad(a2, ((0, M_pad - M), (0, 0)))

    out = pl.pallas_call(
        _inference_kernel,
        out_shape=jax.ShapeDtypeStruct((M_pad, Z2), jnp.float32),
        grid=(M_pad // TM,),
        in_specs=[pl.BlockSpec((TM, H), lambda i: (i, 0)),   # hidden (streamed)
                  pl.BlockSpec((H, Z2), lambda i: (0, 0)),   # fused weights (resident)
                  pl.BlockSpec((1, Z2), lambda i: (0, 0)),   # fused bias (resident)
                  pl.BlockSpec((TM, Z2), lambda i: (i, 0))], # adaptive (streamed)
        out_specs=pl.BlockSpec((TM, Z2), lambda i: (i, 0)),
        compiler_params=pltpu.CompilerParams(
            dimension_semantics=("parallel",)),
    )(h2, w_fused, b_fused, a2)

    out = out[:M]
    mu = out[:, :Z].reshape(lead_shape + (Z,))
    sigma = out[:, Z:].reshape(lead_shape + (Z,))
    return [mu, sigma]


# ----------------------------------------------------------------------------
# Deterministic parameter init (MaskedLinear == nn.Linear with a mask applied)
# ----------------------------------------------------------------------------
def init_params(key, h_dim, z_dim):
    Z, H = sum(z_dim), sum(h_dim)
    k1, k2, k3, k4 = jax.random.split(key, 4)
    bound = 1.0 / np.sqrt(H)       # torch nn.Linear default init range
    w_mean = jax.random.uniform(k1, (Z, H), jnp.float32, -bound, bound)
    b_mean = jax.random.uniform(k2, (Z,), jnp.float32, -bound, bound)
    w_std = jax.random.uniform(k3, (Z, H), jnp.float32, -bound, bound)
    b_std = jax.random.uniform(k4, (Z,), jnp.float32, -bound, bound)
    return (w_mean, b_mean, w_std, b_std)


if __name__ == "__main__":
    h_dim = (24, 16, 8)   # sum = 48
    z_dim = (4, 2, 2)     # sum = 8
    batch = 2
    seq = 5
    H, Z = sum(h_dim), sum(z_dim)

    key = jax.random.PRNGKey(0)
    k_h, k_a, k_h2, k_a2, k_p = jax.random.split(key, 5)

    mask = make_pvrnn_inference_mask(h_dim, z_dim)
    params = init_params(k_p, h_dim, z_dim)
    fused_params = prepare_inference_params(params, mask)   # mask baked in once
    w_mean, b_mean, w_std, b_std = params

    def reference(hid, av):
        mu_r = jnp.tanh(hid @ (w_mean * mask).T + b_mean + av[..., :Z])
        sg_r = jnp.exp(hid @ (w_std * mask).T + b_std + av[..., Z:])
        return mu_r, sg_r

    # ---- per-step call (B, H) ------------------------------------------------
    hidden = jax.random.normal(k_h, (batch, H), jnp.float32)
    adaptive_vars = 0.1 * jax.random.normal(k_a, (batch, 2 * Z), jnp.float32)

    mu, sigma = inference_model_forward(hidden, fused_params, adaptive_vars)
    mu, sigma = jax.block_until_ready((mu, sigma))
    mu_ref, sig_ref = reference(hidden, adaptive_vars)
    np.testing.assert_allclose(np.asarray(mu), np.asarray(mu_ref),
                               rtol=1e-5, atol=1e-5)
    np.testing.assert_allclose(np.asarray(sigma), np.asarray(sig_ref),
                               rtol=1e-5, atol=1e-5)

    # ---- whole-sequence call (T, B, H): one pallas_call, weights resident ----
    hidden_tb = jax.random.normal(k_h2, (seq, batch, H), jnp.float32)
    adaptive_tb = 0.1 * jax.random.normal(k_a2, (seq, batch, 2 * Z), jnp.float32)

    mu_t, sigma_t = inference_model_forward(hidden_tb, fused_params, adaptive_tb)
    mu_t, sigma_t = jax.block_until_ready((mu_t, sigma_t))
    mu_tr, sig_tr = reference(hidden_tb, adaptive_tb)
    np.testing.assert_allclose(np.asarray(mu_t), np.asarray(mu_tr),
                               rtol=1e-5, atol=1e-5)
    np.testing.assert_allclose(np.asarray(sigma_t), np.asarray(sig_tr),
                               rtol=1e-5, atol=1e-5)

    # ---- None path (returns NaNs, no kernel launch — matches torch) ---------
    mu_nan, sig_nan = inference_model_forward(hidden, fused_params, None)
    assert mu_nan.shape == (batch, Z) and sig_nan.shape == (batch, Z)
    assert bool(jnp.all(jnp.isnan(mu_nan))) and bool(jnp.all(jnp.isnan(sig_nan)))

    print("KERNEL_OK")
</pallas_src>

<mosaic_0001>
module attributes {stable_mosaic.version = 11 : i64} {
  func.func @_inference_kernel(%arg0: i32, %arg1: memref<8x48xf32, #tpu.memory_space<vmem>>, %arg2: memref<48x16xf32, #tpu.memory_space<vmem>>, %arg3: memref<1x16xf32, #tpu.memory_space<vmem>>, %arg4: memref<8x16xf32, #tpu.memory_space<vmem>>, %arg5: memref<8x16xf32, #tpu.memory_space<vmem>>) attributes {dimension_semantics = [#tpu.dimension_semantics<parallel>], iteration_bounds = array<i64: 1>, scalar_prefetch = 0 : i64, scratch_operands = 0 : i64, tpu.core_type = #tpu.core_type<tc>, window_params = [{transform_indices = @transform_0, window_bounds = array<i64: 8, 48>}, {pipeline_mode = #tpu.pipeline_mode<synchronous>, transform_indices = @transform_1, window_bounds = array<i64: 48, 16>}, {pipeline_mode = #tpu.pipeline_mode<synchronous>, transform_indices = @transform_2, window_bounds = array<i64: 1, 16>}, {transform_indices = @transform_3, window_bounds = array<i64: 8, 16>}, {transform_indices = @transform_4, window_bounds = array<i64: 8, 16>}]} {
    %c0 = arith.constant 0 : index
    %c0_0 = arith.constant 0 : index
    %0 = vector.load %arg1[%c0, %c0_0] : memref<8x48xf32, #tpu.memory_space<vmem>>, vector<8x48xf32>
    %c0_1 = arith.constant 0 : index
    %c0_2 = arith.constant 0 : index
    %1 = vector.load %arg2[%c0_1, %c0_2] : memref<48x16xf32, #tpu.memory_space<vmem>>, vector<48x16xf32>
    %cst = arith.constant dense<0.000000e+00> : vector<8x16xf32>
    %2 = tpu.matmul %0, %1, %cst {dimension_numbers = #tpu.dot_dimension_numbers<[1], [0], [0], [1], [0, 0, 1, 1], [], []>} : vector<8x48xf32>, vector<48x16xf32>, vector<8x16xf32> -> vector<8x16xf32>
    %c0_3 = arith.constant 0 : index
    %c0_4 = arith.constant 0 : index
    %3 = vector.load %arg3[%c0_3, %c0_4] : memref<1x16xf32, #tpu.memory_space<vmem>>, vector<1x16xf32>
    %4 = vector.broadcast %3 : vector<1x16xf32> to vector<8x16xf32>
    %5 = arith.addf %2, %4 : vector<8x16xf32>
    %c0_5 = arith.constant 0 : index
    %c0_6 = arith.constant 0 : index
    %6 = vector.load %arg4[%c0_5, %c0_6] : memref<8x16xf32, #tpu.memory_space<vmem>>, vector<8x16xf32>
    %7 = arith.addf %5, %6 : vector<8x16xf32>
    %8 = tpu.iota {dimensions = array<i32: 1>} : vector<8x16xi32>
    %c8_i32 = arith.constant 8 : i32
    %9 = vector.broadcast %c8_i32 : i32 to vector<8x16xi32>
    %10 = arith.cmpi slt, %8, %9 : vector<8x16xi32>
    %11 = math.tanh %7 : vector<8x16xf32>
    %12 = math.exp %7 : vector<8x16xf32>
    %13 = arith.select %10, %11, %12 : vector<8x16xi1>, vector<8x16xf32>
    %c0_7 = arith.constant 0 : index
    %c0_8 = arith.constant 0 : index
    %14 = vector.load %arg5[%c0_7, %c0_8] : memref<8x16xf32, #tpu.memory_space<vmem>>, vector<8x16xf32>
    tpu.vector_store %arg5[%c0_7, %c0_8], %13 {strides = array<i32>} : memref<8x16xf32, #tpu.memory_space<vmem>>, vector<8x16xf32>,
    return
  }
  func.func @transform_0(%arg0: i32) -> (i32, i32) {
    %c0_i32 = arith.constant 0 : i32
    %c0_i32_0 = arith.constant 0 : i32
    return %arg0, %c0_i32 : i32, i32
  }
  func.func @transform_1(%arg0: i32) -> (i32, i32) {
    %c0_i32 = arith.constant 0 : i32
    %c0_i32_0 = arith.constant 0 : i32
    %c0_i32_1 = arith.constant 0 : i32
    return %c0_i32, %c0_i32_0 : i32, i32
  }
  func.func @transform_2(%arg0: i32) -> (i32, i32) {
    %c0_i32 = arith.constant 0 : i32
    %c0_i32_0 = arith.constant 0 : i32
    %c0_i32_1 = arith.constant 0 : i32
    return %c0_i32, %c0_i32_0 : i32, i32
  }
  func.func @transform_3(%arg0: i32) -> (i32, i32) {
    %c0_i32 = arith.constant 0 : i32
    %c0_i32_0 = arith.constant 0 : i32
    return %arg0, %c0_i32 : i32, i32
  }
  func.func @transform_4(%arg0: i32) -> (i32, i32) {
    %c0_i32 = arith.constant 0 : i32
    %c0_i32_0 = arith.constant 0 : i32
    return %arg0, %c0_i32 : i32, i32
  }
}

</mosaic_0001>

<bundles_post_ra>
// kernel: tpu_custom_call.1
= control target key start
LH: loop header
LB: loop body
LE: loop exit
PB: predicated region body
PF: predicated region fallthrough
CT: control target
= control target key end

     0   :  { %v196_v3 = vmov 0.0|0.0   ;;  %vm197_vm0 = vmmov 0   ;;  %v198_v6 = vmov 0.0   ;;  %s264_s0 = inlined_call_operand.vmem [shape: f32[8,48], index: 0, kind: input, shape index: {}]   ;;  %s265_s1 = inlined_call_operand.vmem [shape: f32[48,16], index: 1, kind: input, shape index: {}]   ;;  %s266_s2 = inlined_call_operand.vmem [shape: f32[1,16], index: 2, kind: input, shape index: {}]   ;;  %s267_s3 = inlined_call_operand.vmem [shape: f32[8,16], index: 3, kind: input, shape index: {}]   ;;  %s268_s4 = inlined_call_operand.hbm [shape: f32[8,16], index: 4, kind: output, shape index: {}]  }
   0x1   :  { %v19_v0 = vld [vmem:[%s265_s1] sm:$0xff]  ;;  %v20_v1 = vld [vmem:[%s265_s1 + $0x8] sm:$0xff]  ;;  %v21_v2 = vld [vmem:[%s265_s1 + $0x10] sm:$0xff]  ;;  %155 = vmatprep.subr.bf16.mxu0 %v196_v3  ;;  %152 = vmatprep.mubr.msk.f32.mxu0 %vm197_vm0, %v198_v6 }
   0x2   :  { %v156_v4 = vpack.c.bf16 %v20_v1, %v19_v0  ;;  %v22_v5 = vld [vmem:[%s265_s1 + $0x18] sm:$0xff] }
   0x3   :  { %9 = vsyncpa [#allocation3], 0  ;;  %v159_v7 = vpack.c.bf16 %v22_v5, %v21_v2  ;;  %v23_v8 = vld [vmem:[%s265_s1 + $0x20] sm:$0xff]  ;;  %v24_v9 = vld [vmem:[%s265_s1 + $0x28] sm:$0xff]  ;;  %vm32_vm1 = vcmask 392192   ;;  %v108_v19 = vlaneseq  ;;  %vm115_vm3 = vcmask 130048  }
   0x4   :  { %157 = vmatpush3.bf16.msra.mxu0 %v156_v4  ;;  %v162_v10 = vpack.c.bf16 %v24_v9, %v23_v8  ;;  %v18_v11 = vld [vmem:[%s264_s0] sm:$0xff]  ;;  %s199_s0 = smov [#allocation2]  }
   0x5   :  { %158 = vmatprep.subr.bf16.mxu0 %v196_v3  ;;  %v131_v12 = vld [vmem:[%s266_s2] ss:$0 sm:$0xff]  ;;  %v109_v20 = vand.u32 127, %v108_v19  ;;  %s123_s1 = sshll.u32 %s199_s0, 4  ;;  %s124_s1 = int_to_ptr.vmem [resolvable:$true] %s123_s1 }
   0x6   :  { %v106_v14 = vld [vmem:[%s267_s3] sm:$0xff]  ;;  %s172_s2 = scalar_lea.vmem %s124_s1, 128  ;;  %p177_p1 = scmp.lt.s32.totalorder %s124_s1, %s124_s1 }
   0x7   :  { %vm110_vm2 = vcmp.lt.s32.totalorder %v109_v20, 8  ;;  %p173_p0 = scmp.ne.s32.totalorder %s124_s1, %s172_s2  ;;  %p178_p2 = scmp.lt.s32.totalorder %s172_s2, %s172_s2 }
   0x8   :  { %160 = vmatpush3.bf16.msra.mxu0 %v159_v7 }
   0x9   :  { %161 = vmatprep.subr.bf16.mxu0 %v196_v3  ;;  %p179_p3 = por %p178_p2, %p177_p1 }
   0xb   :  { %p180_p4 = pnand %p179_p3, %p173_p0 }
   0xc   :  { %163 = vmatpush3.bf16.msra.mxu0 %v162_v10 }
   0xf   :  { %153 = vmatmul.mubr.msk.f32.vlgmr.msra.gmra.mrb[0].mxu0 %vm32_vm1, %v18_v11 }
  0xe2   :  { %v102_v13 = vpop.f32.mrb[0].mxu0 }
  0xe3   :  { %v103_v15 = vadd.f32 %v131_v12, %v102_v13  ;;  %v154_v16 = vpop.f32.mrb[1].mxu0 }
  0xe5   :  { %v107_v17 = vadd.f32 %v106_v14, %v103_v15 }
  0xe7   :  { %v112_v18 = vmul.f32 1.442695, %v107_v17  ;;  %168 = vtanh.f32 %v107_v17 }
  0xe9   :  { %170 = vpow2.f32 %v112_v18 }
  0xf1   :  { %v169_v21 = vpop.eup %168 }
  0xf3   :  { %v171_v22 = vpop.eup %170 }
  0xf4   :  { %v114_v23 = vsel %vm110_vm2, %v169_v21, %v171_v22 }
  0xf5   :  { %116 = vst.msk [vmem:[#allocation2] sm:$0xff] %vm115_vm3, %v114_v23 }
  0xf6   :  { %183 = shalt.err (!%p180_p4)
}
  0xf7   :  { %s184_s8 = scalar_lea.hbm %s268_s4, 128 }
  0xf8   :  { %p185_p5 = scmp.ne.s32.totalorder %s268_s4, %s184_s8  ;;  %p188_p6 = scmp.lt.u32.totalorder %s184_s8, %s268_s4 }
  0xfa   :  { %p190_p7 = pnand %p188_p6, %p185_p5 }
  0xfc   :  { %193 = shalt.err (!%p190_p7)
}
  0xfd   :  { %126 = dma.vmem_to_hbm [thread:$0]  %s124_s1, 128, %s268_s4, [#allocation3]  }
  0xfe   :  { %194 = dma.done.wait [#allocation3], 128  }
  0xff   :  { %195 = vsyncadd [#allocation3], 4294967168 }
 0x100   :  { %130 = vsyncpa [#allocation3], 1 }

</bundles_post_ra>
